<compile_context>
chip_gen: v5e
topology: v5e:2x2
jax: 0.10.0
libtpu: 0.0.40
codegen_flags: <defaults>
</compile_context>

<pallas_src>
import functools
import math

import jax
import jax.numpy as jnp
from jax.experimental import pallas as pl
from jax.experimental.pallas import tpu as pltpu

# Module hyper-parameter defaults (NonlinearPlasticLayer defaults).
R_MAX = 1.0
I50 = 0.5
N_EXP = 2.0
EPS = 1e-6

TILE_M = 512            # rows per grid step
TILE_N = 512            # output columns per grid step (multiple of 128 lanes)
TILE_K = 512            # reduction chunk when in_features is tiled
MAX_RESIDENT_K = 2048   # below this, keep full K per block (no K grid axis)
VMEM_LIMIT = 32 * 1024 * 1024


def _epilogue(z, b, pr, o_ref, *, r_max, i50, n_exp):
    """Bias + softplus + Naka-Rushton (Hill) nonlinearity + plasticity scale."""
    z = z + b
    # Numerically stable softplus: max(z,0) + log1p(exp(-|z|))  (EUP exp/log).
    a = jnp.maximum(z, 0.0) + jnp.log1p(jnp.exp(-jnp.abs(z)))
    a_n = a * a if n_exp == 2.0 else a ** n_exp          # fast path for n == 2
    denom = a_n + (i50 ** n_exp + EPS)                   # python-constant fold
    scale = r_max * (1.0 + pr)                           # scalar from SMEM
    out = scale * a_n * pl.reciprocal(denom, approx=True)
    o_ref[...] = out.astype(o_ref.dtype)


def _kernel_fused(x_ref, w_ref, b_ref, pr_ref, o_ref, *, r_max, i50, n_exp):
    # 2D grid (M-tiles x N-tiles), full K resident per block.
    w = w_ref[...]
    z = jnp.dot(x_ref[...].astype(w.dtype), w, preferred_element_type=jnp.float32)
    _epilogue(z, b_ref[...], pr_ref[0], o_ref, r_max=r_max, i50=i50, n_exp=n_exp)


def _kernel_ktiled(x_ref, w_ref, b_ref, pr_ref, o_ref, acc_ref, *,
                   r_max, i50, n_exp, k_total, tile_k):
    # 3D grid (M-tiles x N-tiles x K-chunks), f32 accumulator in VMEM scratch.
    k = pl.program_id(2)

    @pl.when(k == 0)
    def _():
        acc_ref[...] = jnp.zeros_like(acc_ref)

    x = x_ref[...]
    w = w_ref[...]
    if k_total % tile_k != 0:
        # Ragged last K block: zero the out-of-range slice of BOTH operands so
        # stale VMEM garbage (possibly inf/nan) never reaches the accumulator.
        base = k * tile_k
        xcol = jax.lax.broadcasted_iota(jnp.int32, x.shape, 1)
        x = jnp.where(base + xcol < k_total, x, 0)
        wrow = jax.lax.broadcasted_iota(jnp.int32, w.shape, 0)
        w = jnp.where(base + wrow < k_total, w, 0)

    acc_ref[...] += jnp.dot(x.astype(w.dtype), w, preferred_element_type=jnp.float32)

    @pl.when(k == pl.num_programs(2) - 1)
    def _():
        _epilogue(acc_ref[...], b_ref[...], pr_ref[0], o_ref,
                  r_max=r_max, i50=i50, n_exp=n_exp)


def nonlinear_plastic_layer(x, w, b, plasticity_rate, *,
                            r_max=R_MAX, i50=I50, n_exp=N_EXP,
                            tile_m=None, tile_n=None, tile_k=None,
                            max_resident_k=MAX_RESIDENT_K):
    """Forward pass of NonlinearPlasticLayer.

    x : (..., K) activations (f32; any float dtype works)
    w : (K, N)   weight in math layout (transpose of torch Linear.weight);
                 cast once to bf16 at init to use bf16 MXU operands (v6e/v7x)
    b : (N,)     bias (same dtype as w)
    plasticity_rate : (1,) f32 learned scalar
    """
    *lead, K = x.shape
    Kw, N = w.shape
    assert Kw == K, "weight must be (in_features, out_features)"
    M = math.prod(lead) if lead else 1
    x2 = x.reshape(M, K)        # collapse leading dims (no data movement)
    b2 = b.reshape(1, N)

    tile_m = tile_m or min(TILE_M, M)
    tile_n = tile_n or (N if N <= TILE_N else TILE_N)
    gm = pl.cdiv(M, tile_m)
    gn = pl.cdiv(N, tile_n)

    cost = pl.CostEstimate(
        flops=2 * M * K * N + 10 * M * N,
        transcendentals=3 * M * N,              # exp + log1p + reciprocal
        bytes_accessed=(x2.size * x2.dtype.itemsize
                        + w.size * w.dtype.itemsize
                        + b.size * b.dtype.itemsize
                        + M * N * x.dtype.itemsize),
    )
    pr_spec = pl.BlockSpec(memory_space=pltpu.MemorySpace.SMEM)

    if K <= max_resident_k and tile_k is None:
        # Small/medium in_features: full K per block, fused matmul + epilogue.
        kernel = functools.partial(_kernel_fused, r_max=r_max, i50=i50, n_exp=n_exp)
        grid_spec = pltpu.PrefetchScalarGridSpec(
            num_scalar_prefetch=0,
            grid=(gm, gn),
            in_specs=[
                pl.BlockSpec((tile_m, K), lambda i, j: (i, 0)),
                pl.BlockSpec((K, tile_n), lambda i, j: (0, j)),
                pl.BlockSpec((1, tile_n), lambda i, j: (0, j)),
                pr_spec,
            ],
            out_specs=pl.BlockSpec((tile_m, tile_n), lambda i, j: (i, j)),
        )
        semantics = ("parallel", "parallel")
    else:
        # Large in_features: tile K (last grid axis, "arbitrary") + accumulator.
        tile_k = tile_k or TILE_K
        gk = pl.cdiv(K, tile_k)
        kernel = functools.partial(_kernel_ktiled, r_max=r_max, i50=i50,
                                   n_exp=n_exp, k_total=K, tile_k=tile_k)
        grid_spec = pltpu.PrefetchScalarGridSpec(
            num_scalar_prefetch=0,
            grid=(gm, gn, gk),
            in_specs=[
                pl.BlockSpec((tile_m, tile_k), lambda i, j, k: (i, k)),
                pl.BlockSpec((tile_k, tile_n), lambda i, j, k: (k, j)),
                pl.BlockSpec((1, tile_n), lambda i, j, k: (0, j)),
                pr_spec,
            ],
            out_specs=pl.BlockSpec((tile_m, tile_n), lambda i, j, k: (i, j)),
            scratch_shapes=[pltpu.VMEM((tile_m, tile_n), jnp.float32)],
        )
        semantics = ("parallel", "parallel", "arbitrary")

    out = pl.pallas_call(
        kernel,
        out_shape=jax.ShapeDtypeStruct((M, N), x.dtype),
        grid_spec=grid_spec,
        compiler_params=pltpu.CompilerParams(
            dimension_semantics=semantics,
            vmem_limit_bytes=VMEM_LIMIT,
        ),
        cost_estimate=cost,
    )(x2, w, b2, plasticity_rate)

    return out.reshape(*lead, N)


def reference(x, w, b, plasticity_rate, *, r_max=R_MAX, i50=I50, n_exp=N_EXP):
    """Pure-JAX reference mirroring the PyTorch forward."""
    z = x @ w + b
    a = jax.nn.softplus(z)
    a_n = a ** n_exp
    denom = a_n + i50 ** n_exp + EPS
    return r_max * (a_n / denom) * (1.0 + plasticity_rate)


if __name__ == "__main__":
    key = jax.random.PRNGKey(0)
    k_x, k_w, k_b, k_x2, k_w2, k_b2 = jax.random.split(key, 6)

    # --- main case: batch=2, seq=8, in_features=32 -> out_features=32 (f32) ---
    B, T, IN_F, OUT_F = 2, 8, 32, 32
    x = jax.random.normal(k_x, (B, T, IN_F), dtype=jnp.float32)
    bound = 1.0 / math.sqrt(IN_F)
    w = jax.random.uniform(k_w, (IN_F, OUT_F), jnp.float32, -bound, bound)
    b = jax.random.uniform(k_b, (OUT_F,), jnp.float32, -bound, bound)
    # nn.Parameter(torch.zeros(1)) at init; use a nonzero value so the
    # plasticity scaling path is actually exercised.
    plasticity_rate = jnp.full((1,), 0.05, dtype=jnp.float32)

    out = jax.block_until_ready(nonlinear_plastic_layer(x, w, b, plasticity_rate))
    ref = reference(x, w, b, plasticity_rate)
    assert out.shape == (B, T, OUT_F)
    # Tolerance loosened slightly vs exact f32 because of the approximate
    # reciprocal (vrcp) used for the Hill denominator.
    assert jnp.allclose(out, ref, atol=5e-3, rtol=5e-3), "f32 mismatch vs reference"

    # --- bf16 MXU-operand path (params cast ONCE, as recommended for v6e/v7x) ---
    w_bf16 = w.astype(jnp.bfloat16)
    b_bf16 = b.astype(jnp.bfloat16)
    out_bf = jax.block_until_ready(
        nonlinear_plastic_layer(x, w_bf16, b_bf16, plasticity_rate))
    ref_bf = reference(x, w_bf16.astype(jnp.float32), b_bf16.astype(jnp.float32),
                       plasticity_rate)
    assert jnp.allclose(out_bf, ref_bf, atol=2e-2, rtol=2e-2), "bf16 mismatch"

    # --- ragged-M + tiled/ragged-K path (forces the accumulator kernel) ---
    B2, T2, IN2, OUT2 = 3, 7, 192, 64
    x3 = jax.random.normal(k_x2, (B2, T2, IN2), dtype=jnp.float32)
    bound2 = 1.0 / math.sqrt(IN2)
    w3 = jax.random.uniform(k_w2, (IN2, OUT2), jnp.float32, -bound2, bound2)
    b3 = jax.random.uniform(k_b2, (OUT2,), jnp.float32, -bound2, bound2)
    out3 = jax.block_until_ready(
        nonlinear_plastic_layer(x3, w3, b3, plasticity_rate, tile_m=8, tile_k=128))
    ref3 = reference(x3, w3, b3, plasticity_rate)
    assert out3.shape == (B2, T2, OUT2)
    assert jnp.allclose(out3, ref3, atol=5e-3, rtol=5e-3), "K-tiled mismatch vs reference"

    print("KERNEL_OK")
</pallas_src>

<mosaic_0001>
module attributes {stable_mosaic.version = 11 : i64} {
  func.func @_kernel_fused(%arg0: i32, %arg1: i32, %arg2: memref<16x32xf32, #tpu.memory_space<vmem>>, %arg3: memref<32x32xf32, #tpu.memory_space<vmem>>, %arg4: memref<1x32xf32, #tpu.memory_space<vmem>>, %arg5: memref<1xf32, #tpu.memory_space<smem>>, %arg6: memref<16x32xf32, #tpu.memory_space<vmem>>) attributes {dimension_semantics = [#tpu.dimension_semantics<parallel>, #tpu.dimension_semantics<parallel>], iteration_bounds = array<i64: 1, 1>, scalar_prefetch = 0 : i64, scratch_operands = 0 : i64, tpu.core_type = #tpu.core_type<tc>, window_params = [{transform_indices = @transform_0, window_bounds = array<i64: 16, 32>}, {transform_indices = @transform_1, window_bounds = array<i64: 32, 32>}, {transform_indices = @transform_2, window_bounds = array<i64: 1, 32>}, {transform_indices = @transform_3, window_bounds = array<i64: 1>}, {transform_indices = @transform_4, window_bounds = array<i64: 16, 32>}]} {
    %c0 = arith.constant 0 : index
    %c0_0 = arith.constant 0 : index
    %0 = vector.load %arg3[%c0, %c0_0] : memref<32x32xf32, #tpu.memory_space<vmem>>, vector<32x32xf32>
    %c0_1 = arith.constant 0 : index
    %c0_2 = arith.constant 0 : index
    %1 = vector.load %arg2[%c0_1, %c0_2] : memref<16x32xf32, #tpu.memory_space<vmem>>, vector<16x32xf32>
    %cst = arith.constant dense<0.000000e+00> : vector<16x32xf32>
    %2 = tpu.matmul %1, %0, %cst {dimension_numbers = #tpu.dot_dimension_numbers<[1], [0], [0], [1], [0, 0, 1, 1], [], []>} : vector<16x32xf32>, vector<32x32xf32>, vector<16x32xf32> -> vector<16x32xf32>
    %c0_3 = arith.constant 0 : index
    %c0_4 = arith.constant 0 : index
    %3 = vector.load %arg4[%c0_3, %c0_4] : memref<1x32xf32, #tpu.memory_space<vmem>>, vector<1x32xf32>
    %c0_5 = arith.constant 0 : index
    %4 = memref.load %arg5[%c0_5] : memref<1xf32, #tpu.memory_space<smem>>
    %5 = vector.broadcast %3 : vector<1x32xf32> to vector<16x32xf32>
    %6 = arith.addf %2, %5 : vector<16x32xf32>
    %cst_6 = arith.constant 0.000000e+00 : f32
    %7 = vector.broadcast %cst_6 : f32 to vector<16x32xf32>
    %8 = arith.maximumf %6, %7 : vector<16x32xf32>
    %9 = math.absf %6 : vector<16x32xf32>
    %cst_7 = arith.constant 0.000000e+00 : f32
    %10 = vector.broadcast %cst_7 : f32 to vector<16x32xf32>
    %11 = arith.subf %10, %9 : vector<16x32xf32>
    %12 = math.exp %11 : vector<16x32xf32>
    %13 = math.log1p %12 : vector<16x32xf32>
    %14 = arith.addf %8, %13 : vector<16x32xf32>
    %15 = arith.mulf %14, %14 : vector<16x32xf32>
    %cst_8 = arith.constant 2.500010e-01 : f32
    %16 = vector.broadcast %cst_8 : f32 to vector<16x32xf32>
    %17 = arith.addf %15, %16 : vector<16x32xf32>
    %cst_9 = arith.constant 1.000000e+00 : f32
    %18 = arith.addf %cst_9, %4 : f32
    %cst_10 = arith.constant 1.000000e+00 : f32
    %19 = arith.mulf %cst_10, %18 : f32
    %20 = vector.broadcast %19 : f32 to vector<16x32xf32>
    %21 = arith.mulf %20, %15 : vector<16x32xf32>
    %22 = tpu.reciprocal %17 {approx = true} : vector<16x32xf32> -> vector<16x32xf32>
    %23 = arith.mulf %21, %22 : vector<16x32xf32>
    %c0_11 = arith.constant 0 : index
    %c0_12 = arith.constant 0 : index
    %24 = vector.load %arg6[%c0_11, %c0_12] : memref<16x32xf32, #tpu.memory_space<vmem>>, vector<16x32xf32>
    tpu.vector_store %arg6[%c0_11, %c0_12], %23 {strides = array<i32>} : memref<16x32xf32, #tpu.memory_space<vmem>>, vector<16x32xf32>,
    return
  }
  func.func @transform_0(%arg0: i32, %arg1: i32) -> (i32, i32) {
    %c0_i32 = arith.constant 0 : i32
    %c0_i32_0 = arith.constant 0 : i32
    return %arg0, %c0_i32 : i32, i32
  }
  func.func @transform_1(%arg0: i32, %arg1: i32) -> (i32, i32) {
    %c0_i32 = arith.constant 0 : i32
    %c0_i32_0 = arith.constant 0 : i32
    return %c0_i32, %arg1 : i32, i32
  }
  func.func @transform_2(%arg0: i32, %arg1: i32) -> (i32, i32) {
    %c0_i32 = arith.constant 0 : i32
    %c0_i32_0 = arith.constant 0 : i32
    return %c0_i32, %arg1 : i32, i32
  }
  func.func @transform_3(%arg0: i32, %arg1: i32) -> i32 {
    %c0_i32 = arith.constant 0 : i32
    %c0_i32_0 = arith.constant 0 : i32
    return %c0_i32 : i32
  }
  func.func @transform_4(%arg0: i32, %arg1: i32) -> (i32, i32) {
    %c0_i32 = arith.constant 0 : i32
    return %arg0, %arg1 : i32, i32
  }
}

</mosaic_0001>

<bundles_post_ra>
// kernel: tpu_custom_call.1
= control target key start
LH: loop header
LB: loop body
LE: loop exit
PB: predicated region body
PF: predicated region fallthrough
CT: control target
= control target key end

     0   :  { %10 = vsyncpa [#allocation4], 0  ;;  %s316_s0 = inlined_call_operand.hbm [shape: f32[16,32], index: 0, kind: input, shape index: {}]   ;;  %s317_s1 = inlined_call_operand.hbm [shape: f32[32,32], index: 1, kind: input, shape index: {}]   ;;  %s318_s2 = inlined_call_operand.vmem [shape: f32[1,32], index: 2, kind: input, shape index: {}]   ;;  %s319_s3 = inlined_call_operand.<no memory space> [shape: f32[1], index: 3, kind: input, shape index: {}]   ;;  %s320_s4 = inlined_call_operand.hbm [shape: f32[16,32], index: 4, kind: output, shape index: {}]  }
   0x1   :  { %11 = vsyncpa [#allocation7], 0 }
   0x2   :  { %12 = vsyncpa [#allocation5], 0  ;;  %s17_s17 = sshll.u32 %s316_s0, 4  ;;  %s258_s18 = smov [#allocation3]   ;;  %s18_s17 = int_to_ptr.hbm [resolvable:$true] %s17_s17 }
   0x3   :  { %s19_s19 = sshll.u32 %s258_s18, 4  ;;  %s30_s22 = sshll.u32 %s317_s1, 4  ;;  %s20_s19 = int_to_ptr.vmem [resolvable:$true] %s19_s19  ;;  %s31_s22 = int_to_ptr.hbm [resolvable:$true] %s30_s22 }
   0x4   :  { %s259_s23 = smov 128   ;;  %s260_s24 = smov 8  }
   0x5   :  { %25 = dma.hbm_to_vmem [thread:$0]  %s18_s17, 256, %s20_s19, [#allocation4], %s259_s23, %s259_s23, %s260_s24  }
   0x6   :  { %s261_s25 = smov [#allocation6]  }
   0x7   :  { %s32_s26 = sshll.u32 %s261_s25, 4  ;;  %s33_s26 = int_to_ptr.vmem [resolvable:$true] %s32_s26 }
   0x8   :  { %38 = dma.hbm_to_vmem [thread:$0]  %s31_s22, 512, %s33_s26, [#allocation7], %s259_s23, %s259_s23, %s260_s24  }
   0x9   :  { %252 = dma.done.wait [#allocation4], 256  }
   0xa   :  { %253 = vsyncadd [#allocation4], 4294967040 }
   0xb   :  { %254 = dma.done.wait [#allocation7], 512  }
   0xc   :  { %255 = vsyncadd [#allocation7], 4294966784  ;;  %v54_v0 = vld [vmem:[#allocation6 + $0x18] sm:$0xff]  ;;  %v53_v1 = vld [vmem:[#allocation6 + $0x10] sm:$0xff]  ;;  %vm62_vm0 = vcmask 261120   ;;  %s126_s28 = sadd.f32 1.0, %s319_s3 }
   0xd   :  { %81 = vmatpush.msra.mxu0 %v54_v0  ;;  %158 = vmatpush.msra.mxu1 %v54_v0  ;;  %v52_v2 = vld [vmem:[#allocation6 + $0x8] sm:$0xff]  ;;  %v51_v3 = vld [vmem:[#allocation6] sm:$0xff]  ;;  %v55_v4 = vld [vmem:[#allocation3] sm:$0xff]  ;;  %s262_s29 = smov [#allocation8]   ;;  %s142_s7 = sshll.u32 %s320_s4, 4  ;;  %s143_s7 = int_to_ptr.hbm [resolvable:$true] %s142_s7 }
   0xe   :  { %v56_v5 = vld [vmem:[#allocation3 + $0x8] sm:$0xff]  ;;  %v167_v6 = vld [vmem:[%s318_s2] ss:$0 sm:$0xff]  ;;  %v127_v43 = vstv %s126_s28  ;;  %s140_s30 = sshll.u32 %s262_s29, 4  ;;  %s141_s30 = int_to_ptr.vmem [resolvable:$true] %s140_s30 }
   0xf   :  { %82 = vmatpush.msra.mxu0 %v53_v1  ;;  %159 = vmatpush.msra.mxu1 %v53_v1 }
  0x11   :  { %83 = vmatpush.msra.mxu0 %v52_v2  ;;  %160 = vmatpush.msra.mxu1 %v52_v2 }
  0x13   :  { %84 = vmatpush.msra.mxu0 %v51_v3  ;;  %161 = vmatpush.msra.mxu1 %v51_v3 }
  0x14   :  { %156 = vmatmul.msk.f32.vlgmr.msra.gmra.mxu0 %vm62_vm0, %v55_v4  ;;  %157 = vmatmul.msk.f32.vlgmr.msra.gmra.mxu1 %vm62_vm0, %v56_v5 }
  0x91   :  { %v86_v7 = vpop.f32.mrf.mxu0  ;;  %v89_v8 = vpop.f32.mrf.mxu1 }
  0x92   :  { %v87_v9 = vadd.f32 %v167_v6, %v86_v7  ;;  %v90_v10 = vadd.f32 %v167_v6, %v89_v8 }
  0x94   :  { %v94_v11 = vand.u32 2147483647, %v87_v9  ;;  %v95_v12 = vand.u32 2147483647, %v90_v10  ;;  %v92_v31 = vmax.f32 %v87_v9, 0.0  ;;  %v93_v35 = vmax.f32 %v90_v10, 0.0 }
  0x96   :  { %v96_v13 = vsub.f32 0.0, %v94_v11  ;;  %v97_v14 = vsub.f32 0.0, %v95_v12 }
  0x98   :  { %v98_v15 = vmul.f32 1.442695, %v96_v13  ;;  %v100_v16 = vmul.f32 1.442695, %v97_v14 }
  0x9a   :  { %168 = vpow2.f32 %v98_v15 }
  0x9b   :  { %170 = vpow2.f32 %v100_v16 }
  0xa0   :  { %v169_v17 = vpop.eup %168 }
  0xa1   :  { %v171_v18 = vpop.eup %170  ;;  %v102_v19 = vadd.f32 1.0, %v169_v17  ;;  %v105_v20 = vmul.f32 -0.5, %v169_v17  ;;  %v108_v24 = vand.u32 2147483647, %v169_v17 }
  0xa2   :  { %v111_v21 = vadd.f32 1.0, %v171_v18  ;;  %v114_v22 = vmul.f32 -0.5, %v171_v18  ;;  %v117_v26 = vand.u32 2147483647, %v171_v18 }
  0xa3   :  { %172 = vlog2.f32 %v102_v19  ;;  %v106_v23 = vadd.f32 1.0, %v105_v20  ;;  %vm109_vm1 = vcmp.lt.f32.partialorder %v108_v24, 0.0004427343 }
  0xa4   :  { %174 = vlog2.f32 %v111_v21  ;;  %v115_v25 = vadd.f32 1.0, %v114_v22  ;;  %vm118_vm2 = vcmp.lt.f32.partialorder %v117_v26, 0.0004427343 }
  0xa5   :  { %v107_v30 = vmul.f32 %v169_v17, %v106_v23 }
  0xa6   :  { %v116_v33 = vmul.f32 %v171_v18, %v115_v25 }
  0xa9   :  { %v173_v27 = vpop.eup %172 }
  0xaa   :  { %v175_v28 = vpop.eup %174  ;;  %v104_v29 = vmul.f32 0.6931472, %v173_v27 }
  0xab   :  { %v113_v32 = vmul.f32 0.6931472, %v175_v28 }
  0xac   :  { %v110_v34 = vsel %vm109_vm1, %v107_v30, %v104_v29 }
  0xad   :  { %v120_v36 = vadd.f32 %v110_v34, %v92_v31  ;;  %v119_v37 = vsel %vm118_vm2, %v116_v33, %v113_v32 }
  0xae   :  { %v121_v38 = vadd.f32 %v119_v37, %v93_v35 }
  0xaf   :  { %v122_v39 = vmul.f32 %v120_v36, %v120_v36 }
  0xb0   :  { %v123_v40 = vmul.f32 %v121_v38, %v121_v38 }
  0xb1   :  { %v124_v41 = vadd.f32 0.250001, %v122_v39  ;;  %v128_v44 = vmul.f32 %v127_v43, %v122_v39 }
  0xb2   :  { %v125_v42 = vadd.f32 0.250001, %v123_v40  ;;  %v129_v46 = vmul.f32 %v127_v43, %v123_v40 }
  0xb3   :  { %176 = vrcp.f32 %v124_v41 }
  0xb4   :  { %178 = vrcp.f32 %v125_v42 }
  0xb9   :  { %v177_v45 = vpop.eup %176 }
  0xba   :  { %v179_v47 = vpop.eup %178  ;;  %v132_v48 = vmul.f32 %v177_v45, %v128_v44 }
  0xbb   :  { %v133_v49 = vmul.f32 %v179_v47, %v129_v46 }
  0xbc   :  { %134 = vst.msk [vmem:[#allocation8] sm:$0xff] %vm62_vm0, %v132_v48 }
  0xbd   :  { %135 = vst.msk [vmem:[#allocation8 + $0x8] sm:$0xff] %vm62_vm0, %v133_v49 }
  0xbe   :  { %148 = dma.vmem_to_hbm [thread:$0]  %s141_s30, 256, %s143_s7, [#allocation5], %s259_s23, %s259_s23, %s260_s24  }
  0xbf   :  { %256 = dma.done.wait [#allocation5], 256  }
  0xc0   :  { %257 = vsyncadd [#allocation5], 4294967040 }
  0xc1   :  { %153 = vsyncpa [#allocation4], 1 }
  0xc2   :  { %154 = vsyncpa [#allocation7], 1 }
  0xc3   :  { %155 = vsyncpa [#allocation5], 1 }

</bundles_post_ra>
